<compile_context>
chip_gen: v7x
topology: tpu7x:2x2x1
jax: 0.10.0
libtpu: 0.0.40
codegen_flags: <defaults>
</compile_context>

<pallas_src>
import math

import jax
import jax.numpy as jnp
from jax import lax
from jax.experimental import pallas as pl
from jax.experimental.pallas import tpu as pltpu


def _round_up(v, m):
    return ((v + m - 1) // m) * m


def _vmem_capacity_bytes():
    # Trace-time hardware query; falls back to the smallest per-core VMEM (v7x).
    try:
        cap = int(getattr(pltpu.get_tpu_info(), "vmem_capacity_bytes"))
        if cap > 0:
            return cap
    except Exception:
        pass
    return 64 * 1024 * 1024


def _vmem_limit_bytes():
    # Leave headroom below physical capacity; cap at 100 MiB on 128 MiB parts.
    return min(int(0.7 * _vmem_capacity_bytes()), 100 * 1024 * 1024)


def _pick_tn(Np, C, budget):
    """Lane-dim tile: multiple of 128, divides Np, fits the VMEM budget."""
    if Np <= 512:
        return Np                      # Np is already a multiple of 128
    for tn in (512, 256, 128):
        if Np % tn == 0 and 12 * C * tn <= budget:
            return tn
    return 128


# ----------------------------------------------------------------------------
# Kernel 1 (prep, once per weight): per-column inverse norms + bf16 W copy.
#   F.normalize(W, dim=0) == W * rsqrt(max(sum(W*W, axis=0), eps^2)), eps=1e-12
# ----------------------------------------------------------------------------
def _normalize_prep_kernel(w_ref, w_bf16_ref, inv_ref):
    w = w_ref[...]                                          # f32 (C, tn)
    sumsq = jnp.sum(w * w, axis=0, keepdims=True)           # (1, tn), XLU reduce
    inv_ref[...] = lax.rsqrt(jnp.maximum(sumsq, 1e-24))     # EUP rsqrt, no sqrt+div
    w_bf16_ref[...] = w.astype(jnp.bfloat16)                # MXU operand copy


# ----------------------------------------------------------------------------
# Kernel 2 (GEMM):  out_tile = (x_bf16 @ W_bf16) * inv_norm
# ----------------------------------------------------------------------------
def _norm_linear_kernel(x_ref, w_ref, inv_ref, o_ref):
    acc = jnp.dot(x_ref[...], w_ref[...],                   # MXU, f32 accumulation
                  preferred_element_type=jnp.float32)
    o_ref[...] = (acc * inv_ref[...]).astype(o_ref.dtype)   # apply norm on output


# ----------------------------------------------------------------------------
# Per-weight prep (cache the result across forward calls).
# ----------------------------------------------------------------------------
def prepare_norm_linear_weight(w):
    """Returns (w_bf16 [C, Np], inv_norm [1, Np] f32, out_dim). Run once per weight."""
    C, N = w.shape
    Np = _round_up(N, 128)                                  # lane-dense output

    w_f32 = w.astype(jnp.float32)
    if Np != N:
        w_f32 = jnp.pad(w_f32, ((0, 0), (0, Np - N)))       # zero cols -> zero outputs

    vmem_limit = _vmem_limit_bytes()
    tn = _pick_tn(Np, C, int(0.9 * vmem_limit))

    w_bf16, inv_norm = pl.pallas_call(
        _normalize_prep_kernel,
        out_shape=(jax.ShapeDtypeStruct((C, Np), jnp.bfloat16),
                   jax.ShapeDtypeStruct((1, Np), jnp.float32)),
        grid_spec=pltpu.PrefetchScalarGridSpec(
            num_scalar_prefetch=0,
            grid=(Np // tn,),
            in_specs=[pl.BlockSpec((C, tn), lambda j: (0, j))],
            out_specs=(pl.BlockSpec((C, tn), lambda j: (0, j)),
                       pl.BlockSpec((1, tn), lambda j: (0, j))),
        ),
        compiler_params=pltpu.CompilerParams(
            dimension_semantics=("parallel",),
            vmem_limit_bytes=vmem_limit,
        ),
    )(w_f32)
    return w_bf16, inv_norm, N


# ----------------------------------------------------------------------------
# Forward:  x (..., in_dim) @ normalized weight  ->  (..., out_dim)
# ----------------------------------------------------------------------------
def norm_linear_forward(x, prepared, *, out_dtype=None):
    w_bf16, inv_norm, N = prepared
    C, Np = w_bf16.shape
    assert x.shape[-1] == C, f"in_dim mismatch: {x.shape[-1]} vs {C}"

    lead_shape = x.shape[:-1]
    out_dtype = x.dtype if out_dtype is None else out_dtype
    M = math.prod(lead_shape) if lead_shape else 1
    if M == 0:                                              # empty-batch guard
        return jnp.zeros(lead_shape + (N,), dtype=out_dtype)

    # ---- per-chip tile sizing -----------------------------------------------
    vmem_limit = _vmem_limit_bytes()
    budget = int(0.9 * vmem_limit)
    out_bytes = jnp.dtype(out_dtype).itemsize
    tn = _pick_tn(Np, C, budget)

    tm = 8
    for cand in (1024, 512, 256, 128, 64, 32, 16, 8):
        need = (2 * cand * C * 2           # x tiles (bf16), double-buffered
                + 2 * C * tn * 2           # W tiles (bf16), double-buffered
                + 2 * tn * 4               # inv_norm tiles
                + 2 * cand * tn * out_bytes)  # output tiles
        if need <= budget:
            tm = cand
            break
    tm = min(tm, _round_up(max(M, 8), 8))                   # don't over-tile tiny M
    Mp = _round_up(M, tm)

    # ---- cast to bf16 fused into the reshape/pad copy (no extra HBM pass) ----
    x_p = x.reshape(M, C).astype(jnp.bfloat16)
    if Mp != M:
        x_p = jnp.pad(x_p, ((0, Mp - M), (0, 0)))

    out_p = pl.pallas_call(
        _norm_linear_kernel,
        out_shape=jax.ShapeDtypeStruct((Mp, Np), out_dtype),
        grid_spec=pltpu.PrefetchScalarGridSpec(
            num_scalar_prefetch=0,
            grid=(Mp // tm, Np // tn),
            in_specs=[pl.BlockSpec((tm, C), lambda i, j: (i, 0)),   # x, pipelined over i
                      pl.BlockSpec((C, tn), lambda i, j: (0, j)),   # W (bf16)
                      pl.BlockSpec((1, tn), lambda i, j: (0, j))],  # inv_norm
            out_specs=pl.BlockSpec((tm, tn), lambda i, j: (i, j)),
        ),
        compiler_params=pltpu.CompilerParams(
            dimension_semantics=("parallel", "parallel"),   # megacore shards M and N
            vmem_limit_bytes=vmem_limit,
        ),
    )(x_p, w_bf16, inv_norm)

    out = out_p[:M, :N]
    return out.reshape(lead_shape + (N,))


def norm_linear(x, w, *, out_dtype=None):
    """Uncached convenience path: prep + GEMM in one call."""
    return norm_linear_forward(x, prepare_norm_linear_weight(w), out_dtype=out_dtype)


# ----------------------------------------------------------------------------
if __name__ == "__main__":
    B, T, IN_DIM, OUT_DIM = 2, 8, 32, 10

    key = jax.random.PRNGKey(0)
    kx, kw = jax.random.split(key)

    x = jax.random.normal(kx, (B, T, IN_DIM), jnp.float32)

    # xavier_uniform_(gain=calculate_gain('relu')) as in the module __init__
    gain = math.sqrt(2.0)
    limit = gain * math.sqrt(6.0 / (IN_DIM + OUT_DIM))
    w = jax.random.uniform(kw, (IN_DIM, OUT_DIM), jnp.float32, -limit, limit)

    prepared = prepare_norm_linear_weight(w)        # run once, cache per weight
    out = jax.block_until_ready(norm_linear_forward(x, prepared))
    out2 = jax.block_until_ready(norm_linear_forward(x, prepared))  # reuses cached prep

    # reference: x @ F.normalize(w, dim=0)
    wn = w / jnp.maximum(jnp.linalg.norm(w, axis=0, keepdims=True), 1e-12)
    ref = x @ wn

    assert out.shape == (B, T, OUT_DIM)
    err = float(jnp.max(jnp.abs(out - ref)))
    assert jnp.allclose(out, ref, atol=5e-2, rtol=5e-2), f"max abs err {err}"
    assert jnp.allclose(out2, out), "cached-prep path mismatch"
    print("KERNEL_OK")
</pallas_src>

<mosaic_0001>
module attributes {stable_mosaic.version = 11 : i64} {
  func.func @_normalize_prep_kernel(%arg0: i32, %arg1: memref<32x128xf32, #tpu.memory_space<vmem>>, %arg2: memref<32x128xbf16, #tpu.memory_space<vmem>>, %arg3: memref<1x128xf32, #tpu.memory_space<vmem>>) attributes {dimension_semantics = [#tpu.dimension_semantics<parallel>], iteration_bounds = array<i64: 1>, scalar_prefetch = 0 : i64, scratch_operands = 0 : i64, tpu.core_type = #tpu.core_type<tc>, window_params = [{transform_indices = @transform_0, window_bounds = array<i64: 32, 128>}, {transform_indices = @transform_1, window_bounds = array<i64: 32, 128>}, {transform_indices = @transform_2, window_bounds = array<i64: 1, 128>}]} {
    %c0 = arith.constant 0 : index
    %c0_0 = arith.constant 0 : index
    %0 = vector.load %arg1[%c0, %c0_0] : memref<32x128xf32, #tpu.memory_space<vmem>>, vector<32x128xf32>
    %1 = arith.mulf %0, %0 : vector<32x128xf32>
    %cst = arith.constant dense<0.000000e+00> : vector<128xf32>
    %2 = vector.multi_reduction <add>, %1, %cst [0] : vector<32x128xf32> to vector<128xf32>
    %3 = vector.shape_cast %2 : vector<128xf32> to vector<1x128xf32>
    %cst_1 = arith.constant 1.000000e-24 : f32
    %4 = vector.broadcast %cst_1 : f32 to vector<1x128xf32>
    %5 = arith.maximumf %3, %4 : vector<1x128xf32>
    %6 = math.rsqrt %5 : vector<1x128xf32>
    %c0_2 = arith.constant 0 : index
    %c0_3 = arith.constant 0 : index
    %7 = vector.load %arg3[%c0_2, %c0_3] : memref<1x128xf32, #tpu.memory_space<vmem>>, vector<1x128xf32>
    tpu.vector_store %arg3[%c0_2, %c0_3], %6 {strides = array<i32>} : memref<1x128xf32, #tpu.memory_space<vmem>>, vector<1x128xf32>,
    %8 = arith.truncf %0 : vector<32x128xf32> to vector<32x128xbf16>
    %c0_4 = arith.constant 0 : index
    %c0_5 = arith.constant 0 : index
    %9 = vector.load %arg2[%c0_4, %c0_5] : memref<32x128xbf16, #tpu.memory_space<vmem>>, vector<32x128xbf16>
    tpu.vector_store %arg2[%c0_4, %c0_5], %8 {strides = array<i32>} : memref<32x128xbf16, #tpu.memory_space<vmem>>, vector<32x128xbf16>,
    return
  }
  func.func @transform_0(%arg0: i32) -> (i32, i32) {
    %c0_i32 = arith.constant 0 : i32
    %c0_i32_0 = arith.constant 0 : i32
    return %c0_i32, %arg0 : i32, i32
  }
  func.func @transform_1(%arg0: i32) -> (i32, i32) {
    %c0_i32 = arith.constant 0 : i32
    %c0_i32_0 = arith.constant 0 : i32
    return %c0_i32, %arg0 : i32, i32
  }
  func.func @transform_2(%arg0: i32) -> (i32, i32) {
    %c0_i32 = arith.constant 0 : i32
    %c0_i32_0 = arith.constant 0 : i32
    return %c0_i32, %arg0 : i32, i32
  }
}

</mosaic_0001>

<bundles_post_ra>
// kernel: tpu_custom_call.1
= control target key start
LH: loop header
LB: loop body
LE: loop exit
PB: predicated region body
PF: predicated region fallthrough
CT: control target
= control target key end

     0   :  { %8 = vsyncpa [#allocation3], 0  ;;  %s255_s0 = inlined_call_operand.hbm [shape: f32[32,128], index: 0, kind: input, shape index: {}]   ;;  %s256_s1 = inlined_call_operand.hbm [shape: bf16[32,128], index: 1, kind: output, shape index: {0}]   ;;  %s257_s2 = inlined_call_operand.hbm [shape: f32[1,128], index: 2, kind: output, shape index: {1}]  }
   0x1   :  { %9 = vsyncpa [#allocation4], 0 }
   0x2   :  { %10 = vsyncpa [#allocation7], 0  ;;  %s197_s9 = smov [#allocation2]   ;;  %s125_s13 = scalar_lea.hbm %s255_s0, 512 }
   0x3   :  { %s16_s10 = sshll.u32 %s197_s9, 4  ;;  %p126_p0 = scmp.ne.s32.totalorder %s255_s0, %s125_s13  ;;  %s17_s10 = int_to_ptr.vmem [resolvable:$true] %s16_s10 }
   0x4   :  { %p129_p1 = scmp.lt.u32.totalorder %s125_s13, %s255_s0 }
   0x6   :  { %p131_p2 = pnand %p129_p1, %p126_p0 }
   0x8   :  { %134 = shalt.err (!%p131_p2)
}
   0x9   :  { %s135_s18 = scalar_lea.vmem %s17_s10, 512  ;;  %p140_p4 = scmp.lt.s32.totalorder %s17_s10, %s17_s10 }
   0xa   :  { %p136_p3 = scmp.ne.s32.totalorder %s17_s10, %s135_s18  ;;  %p141_p5 = scmp.lt.s32.totalorder %s135_s18, %s135_s18 }
   0xc   :  { %p142_p6 = por %p141_p5, %p140_p4 }
   0xe   :  { %p143_p7 = pnand %p142_p6, %p136_p3 }
  0x10   :  { %146 = shalt.err (!%p143_p7)
}
  0x11   :  { %s198_s19 = smov 128   ;;  %s199_s20 = smov 8  }
  0x12   :  { %22 = dma.hbm_to_vmem [thread:$0]  %s255_s0, 512, %s17_s10, [#allocation3], %s198_s19, %s198_s19, %s199_s20  }
  0x13   :  { %191 = dma.done.wait [#allocation3], 512  }
  0x14   :  { %192 = vsyncadd [#allocation3], 4294966784  ;;  %s200_s23 = smov [#allocation5]   ;;  %v26_v0 = vld [vmem:[#allocation2] sm:$0xff]  ;;  %v27_v1 = vld [vmem:[#allocation2 + $0x8] sm:$0xff] }
  0x15   :  { %s71_s24 = sshll.u32 %s200_s23, 4  ;;  %v28_v2 = vld [vmem:[#allocation2 + $0x10] sm:$0xff]  ;;  %v29_v3 = vld [vmem:[#allocation2 + $0x18] sm:$0xff]  ;;  %v30_v4 = vmul.f32 %v26_v0, %v26_v0  ;;  %v31_v5 = vmul.f32 %v27_v1, %v27_v1  ;;  %v108_v7 = vpack.c.bf16 %v27_v1, %v26_v0  ;;  %s72_s24 = int_to_ptr.vmem [resolvable:$true] %s71_s24 }
  0x16   :  { %v32_v6 = vmul.f32 %v28_v2, %v28_v2  ;;  %v113_v8 = vpack.c.bf16 %v29_v3, %v28_v2  ;;  %v33_v9 = vmul.f32 %v29_v3, %v29_v3  ;;  %s147_s0 = scalar_lea.vmem %s72_s24, 256  ;;  %p152_p9 = scmp.lt.s32.totalorder %s72_s24, %s72_s24 }
  0x17   :  { %v34_v10 = vadd.f32 %v31_v5, %v30_v4  ;;  %109 = vst [vmem:[#allocation5] sm:$0xff] %v108_v7   ;;  %p148_p8 = scmp.ne.s32.totalorder %s72_s24, %s147_s0  ;;  %p153_p10 = scmp.lt.s32.totalorder %s147_s0, %s147_s0 }
  0x18   :  { %115 = vst [vmem:[#allocation5 + $0x8] sm:$0xff] %v113_v8  }
  0x19   :  { %v35_v11 = vadd.f32 %v34_v10, %v32_v6  ;;  %p154_p11 = por %p153_p10, %p152_p9 }
  0x1b   :  { %p155_p12 = pnand %p154_p11, %p148_p8 }
  0x1d   :  { %158 = shalt.err (!%p155_p12)
}
  0x1e   :  { %s159_s27 = scalar_lea.hbm %s256_s1, 256 }
  0x1f   :  { %p160_p13 = scmp.ne.s32.totalorder %s256_s1, %s159_s27  ;;  %p163_p0 = scmp.lt.u32.totalorder %s159_s27, %s256_s1 }
  0x21   :  { %p165_p1 = pnand %p163_p0, %p160_p13 }
  0x23   :  { %168 = shalt.err (!%p165_p1)
}
  0x24   :  { %s201_s4 = smov 64   ;;  %s202_s5 = smov 4   ;;  %v36_v12 = vadd.f32 %v35_v11, %v33_v9 }
  0x25   :  { %77 = dma.vmem_to_hbm [thread:$0]  %s72_s24, 256, %s256_s1, [#allocation4], %s201_s4, %s201_s4, %s202_s5  }
  0x26   :  { %v37_v13 = vrot.slane %v36_v12, 4  ;;  %s203_s8 = smov [#allocation6]  }
  0x27   :  { %s84_s9 = sshll.u32 %s203_s8, 4  ;;  %s85_s9 = int_to_ptr.vmem [resolvable:$true] %s84_s9 }
  0x28   :  { %v38_v14 = vadd.f32 %v37_v13, %v36_v12  ;;  %s169_s10 = scalar_lea.vmem %s85_s9, 16  ;;  %s173_s11 = scalar_lea.vmem %s85_s9, 32 }
  0x29   :  { %p170_p2 = scmp.ne.s32.totalorder %s85_s9, %s169_s10  ;;  %p174_p3 = scmp.lt.s32.totalorder %s85_s9, %s85_s9 }
  0x2a   :  { %v39_v15 = vrot.slane %v38_v14, 2  ;;  %p175_p4 = scmp.lt.s32.totalorder %s173_s11, %s169_s10 }
  0x2c   :  { %v40_v16 = vadd.f32 %v39_v15, %v38_v14  ;;  %p176_p5 = por %p175_p4, %p174_p3 }
  0x2e   :  { %v41_v17 = vrot.slane %v40_v16, 1  ;;  %p177_p6 = pnand %p176_p5, %p170_p2 }
  0x30   :  { %v42_v18 = vadd.f32 %v41_v17, %v40_v16 }
  0x32   :  { %v43_v19 = vmax.f32 %v42_v18, 1e-24 }
  0x34   :  { %123 = vrsqrt.f32 %v43_v19 }
  0x3e   :  { %v124_v20 = vpop.eup %123 }
  0x3f   :  { %45 = vst [vmem:[#allocation6] sm:$0x1] %v124_v20 }
  0x40   :  { %180 = shalt.err (!%p177_p6)
}
  0x41   :  { %s181_s13 = scalar_lea.hbm %s257_s2, 16 }
  0x42   :  { %p182_p7 = scmp.ne.s32.totalorder %s257_s2, %s181_s13  ;;  %p185_p8 = scmp.lt.u32.totalorder %s181_s13, %s257_s2 }
  0x44   :  { %p187_p9 = pnand %p185_p8, %p182_p7 }
  0x46   :  { %190 = shalt.err (!%p187_p9)
}
  0x47   :  { %87 = dma.vmem_to_hbm [thread:$0]  %s85_s9, 16, %s257_s2, [#allocation7]  }
  0x48   :  { %193 = dma.done.wait [#allocation4], 256  }
  0x49   :  { %194 = vsyncadd [#allocation4], 4294967040 }
  0x4a   :  { %195 = dma.done.wait [#allocation7], 16  }
  0x4b   :  { %196 = vsyncadd [#allocation7], 4294967280 }
  0x4c   :  { %94 = vsyncpa [#allocation3], 1 }
  0x4d   :  { %95 = vsyncpa [#allocation4], 1 }
  0x4e   :  { %96 = vsyncpa [#allocation7], 1 }

</bundles_post_ra>
